<compile_context>
chip_gen: v7x
topology: tpu7x:2x2x1
jax: 0.10.0
libtpu: 0.0.40
codegen_flags: <defaults>
</compile_context>

<pallas_src>
import functools

import jax
import jax.numpy as jnp
from jax.experimental import pallas as pl
from jax.experimental.pallas import tpu as pltpu

_LANE = 128                 # lane width of a vreg
_DEFAULT_TILE_ROWS = 8192   # (8192, 128) f32 tile = 4 MiB per pipeline buffer
_MAX_TILE_ROWS = 16384      # hard cap: 8 MiB/buffer -> 32 MiB of buffers max
_NUM_CORES = 2              # v7x has 2 TCs; harmless serial loop on v5e/v6e


# ----------------------------------------------------------------------------
# "forward" of the abstract BaseNetwork
# ----------------------------------------------------------------------------
def base_forward(x):
    # TODO(synk): BaseNetwork.forward() raises NotImplementedError (abstract);
    # the identity stand-in is a zero-copy passthrough so no HBM traffic is
    # spent on an undefined subclass forward (metric kernel reads x directly).
    return x


# ----------------------------------------------------------------------------
# compute_metrics() hot path:
#   metric_fn := MSE(outputs, targets)   (deterministic synthetic metric)
#   returns   := metric_fn(outputs, targets) * outputs_len
# ----------------------------------------------------------------------------
def _metric_sum_sq_kernel(o_ref, t_ref, m_ref, *, scale, rows, tb,
                          tiles_per_core):
    """Per-core streaming sum((o-t)^2) into a resident (8,128) f32 slab."""
    p = pl.program_id(0)   # core split ("parallel")
    i = pl.program_id(1)   # row-tile loop ("arbitrary", reduction axis last)

    @pl.when(i == 0)
    def _init():
        m_ref[...] = jnp.zeros_like(m_ref)

    # Global (unclamped) row range of this tile -> mask rows past the real
    # extent (partial last tile / overflow tiles of the second core). The
    # index_map clamps the DMA to stay in-bounds; the mask zeroes any
    # duplicated / unspecified rows before squaring.
    blk = p * tiles_per_core + i
    start_row = blk * tb
    row_ids = start_row + jax.lax.broadcasted_iota(jnp.int32, (tb, _LANE), 0)
    valid = row_ids < rows

    d = o_ref[...].astype(jnp.float32) - t_ref[...].astype(jnp.float32)
    d = jnp.where(valid, d, 0.0)
    sq = d * d

    # Pure-VPU per-tile reduce: fold the tile onto an (8,128) slab (the
    # reshape is layout-preserving: each (8,128) chunk is one vreg), then
    # accumulate into the resident output block.
    m_ref[...] += jnp.sum(sq.reshape(tb // 8, 8, _LANE), axis=0)

    @pl.when(i == pl.num_programs(1) - 1)
    def _finalize():
        # scale = batch / n_elems, applied exactly once per core's slab
        # (MSE * outputs_len); wrapper sums the slabs.
        m_ref[...] = m_ref[...] * scale


def compute_metric_sum(outputs, targets, *, tile_rows=_DEFAULT_TILE_ROWS):
    """Pallas equivalent of one term of BaseNetwork.compute_metrics().

    Returns a scalar f32: MSE(outputs, targets) * outputs.shape[0].
    """
    assert outputs.shape == targets.shape, "outputs/targets shape mismatch"
    batch = outputs.shape[0]
    n_elems = outputs.size
    scale = float(batch) / float(n_elems)

    flat_o = outputs.reshape(-1)
    flat_t = targets.reshape(-1)

    # Lane-dense main slab: (rows, 128). Pure reshape when n_elems % 128 == 0
    # (the common case for conv-style outputs) -> zero extra HBM traffic.
    rows = n_elems // _LANE
    aligned = rows * _LANE
    rem = n_elems - aligned

    # Sub-128-element remainder (rare): handled with plain jnp, negligible.
    if rem:
        to = flat_o[aligned:].astype(jnp.float32)
        tt = flat_t[aligned:].astype(jnp.float32)
        tail_sq = jnp.sum((to - tt) * (to - tt))
    else:
        tail_sq = jnp.float32(0.0)

    if rows == 0:
        return tail_sq * scale

    if rem:
        o2 = flat_o[:aligned].reshape(rows, _LANE)
        t2 = flat_t[:aligned].reshape(rows, _LANE)
    else:
        o2 = flat_o.reshape(rows, _LANE)
        t2 = flat_t.reshape(rows, _LANE)

    # Tile rows: multiple of 8 sublanes, >= 8, capped so 2 inputs x 2 pipeline
    # buffers stay well under VMEM on all chips (v7x has only 64 MiB).
    tb = min(int(tile_rows), -(-rows // 8) * 8)
    tb = max(8, -(-tb // 8) * 8)
    tb = min(tb, _MAX_TILE_ROWS)

    total_tiles = pl.cdiv(rows, tb)
    tiles_per_core = pl.cdiv(total_tiles, _NUM_CORES)
    max_blk = total_tiles - 1

    kernel = functools.partial(
        _metric_sum_sq_kernel,
        scale=scale, rows=rows, tb=tb, tiles_per_core=tiles_per_core)

    def in_map(p, i):
        # Clamp so the DMA window always starts in-bounds; the in-kernel mask
        # (computed from the UNclamped index) zeroes any duplicated rows.
        return (jnp.minimum(p * tiles_per_core + i, max_blk), 0)

    grid_spec = pltpu.PrefetchScalarGridSpec(
        num_scalar_prefetch=0,
        grid=(_NUM_CORES, tiles_per_core),
        in_specs=[
            pl.BlockSpec((tb, _LANE), in_map),
            pl.BlockSpec((tb, _LANE), in_map),
        ],
        # One lane-dense (8,128) partial slab per core, resident across the
        # reduction axis i (accumulator pattern).
        out_specs=pl.BlockSpec((8, _LANE), lambda p, i: (p, 0)),
    )

    # VMEM budget: 2 inputs x 2 pipeline buffers x tile + slack (<= 32 MiB,
    # safe on v7x's 64 MiB physical VMEM as well as v5e/v6e).
    itemsize = max(jnp.dtype(outputs.dtype).itemsize,
                   jnp.dtype(targets.dtype).itemsize)
    tile_bytes = tb * _LANE * itemsize
    vmem_limit = min(32 * 1024 * 1024, 2 * 2 * tile_bytes + 8 * 1024 * 1024)

    partial_slabs = pl.pallas_call(
        kernel,
        out_shape=jax.ShapeDtypeStruct((_NUM_CORES * 8, _LANE), jnp.float32),
        grid_spec=grid_spec,
        compiler_params=pltpu.CompilerParams(
            dimension_semantics=("parallel", "arbitrary"),
            vmem_limit_bytes=vmem_limit,
        ),
    )(o2, t2)

    # TODO(synk): if a subclass registers multiple metric_fns, fuse them here
    # as extra accumulators in the same pass (one HBM read for all metrics).
    return jnp.sum(partial_slabs) + tail_sq * scale


# ----------------------------------------------------------------------------
# Plain-JAX reference for correctness checking
# ----------------------------------------------------------------------------
def _ref_metric_sum(outputs, targets):
    b = outputs.shape[0]
    diff = outputs.astype(jnp.float32) - targets.astype(jnp.float32)
    return jnp.mean(diff * diff) * b


if __name__ == "__main__":
    key = jax.random.PRNGKey(0)
    kx, kt, kx2, kt2, kx3, kt3 = jax.random.split(key, 6)

    # NCHW inputs consistent with a conv-style subclass: (B=2, C=4, 16, 16)
    x = jax.random.normal(kx, (2, 4, 16, 16), dtype=jnp.float32)
    targets = jax.random.normal(kt, (2, 4, 16, 16), dtype=jnp.float32)

    # forward (abstract in the reference; zero-copy identity stand-in)
    outputs = base_forward(x)

    # 1) Default (big-tile) path.
    metric_sum = compute_metric_sum(outputs, targets)
    jax.block_until_ready(metric_sum)
    ref = _ref_metric_sum(outputs, targets)
    assert jnp.allclose(metric_sum, ref, rtol=1e-5, atol=1e-5), (
        f"metric mismatch: {metric_sum} vs {ref}")

    # 2) Multi-tile / multi-core-split path: tile_rows=8 -> grid (2, 2) at
    #    this size, exercising init / accumulate / finalize and the core split.
    x3 = jax.random.normal(kx3, (2, 8, 16, 16), dtype=jnp.float32)
    t3 = jax.random.normal(kt3, (2, 8, 16, 16), dtype=jnp.float32)
    metric_sum3 = compute_metric_sum(base_forward(x3), t3, tile_rows=8)
    jax.block_until_ready(metric_sum3)
    ref3 = _ref_metric_sum(x3, t3)
    assert jnp.allclose(metric_sum3, ref3, rtol=1e-5, atol=1e-5), (
        f"metric (multi-tile) mismatch: {metric_sum3} vs {ref3}")

    # 3) Element count NOT a multiple of 128 (exercises in-kernel masking +
    #    wrapper tail handling, no jnp.pad anywhere).
    x2 = jax.random.normal(kx2, (2, 3, 10, 10), dtype=jnp.float32)
    t2 = jax.random.normal(kt2, (2, 3, 10, 10), dtype=jnp.float32)
    metric_sum2 = compute_metric_sum(base_forward(x2), t2, tile_rows=8)
    jax.block_until_ready(metric_sum2)
    ref2 = _ref_metric_sum(x2, t2)
    assert jnp.allclose(metric_sum2, ref2, rtol=1e-5, atol=1e-5), (
        f"metric (masked tail) mismatch: {metric_sum2} vs {ref2}")

    # 4) bf16 passthrough (kernel casts to f32 in-register; half HBM traffic).
    xb = x.astype(jnp.bfloat16)
    tb_ = targets.astype(jnp.bfloat16)
    metric_sum_b = compute_metric_sum(base_forward(xb), tb_)
    jax.block_until_ready(metric_sum_b)
    ref_b = _ref_metric_sum(xb, tb_)
    assert jnp.allclose(metric_sum_b, ref_b, rtol=1e-4, atol=1e-4), (
        f"metric (bf16) mismatch: {metric_sum_b} vs {ref_b}")

    print("KERNEL_OK")
</pallas_src>

<mosaic_0001>
module attributes {stable_mosaic.version = 11 : i64} {
  func.func @_metric_sum_sq_kernel(%arg0: i32, %arg1: i32, %arg2: memref<16x128xf32, #tpu.memory_space<vmem>>, %arg3: memref<16x128xf32, #tpu.memory_space<vmem>>, %arg4: memref<8x128xf32, #tpu.memory_space<vmem>>) attributes {dimension_semantics = [#tpu.dimension_semantics<parallel>, #tpu.dimension_semantics<arbitrary>], iteration_bounds = array<i64: 2, 1>, scalar_prefetch = 0 : i64, scratch_operands = 0 : i64, tpu.core_type = #tpu.core_type<tc>, window_params = [{transform_indices = @transform_0, window_bounds = array<i64: 16, 128>}, {transform_indices = @transform_1, window_bounds = array<i64: 16, 128>}, {transform_indices = @transform_2, window_bounds = array<i64: 8, 128>}]} {
    %c0_i32 = arith.constant 0 : i32
    %0 = arith.cmpi eq, %arg1, %c0_i32 : i32
    %1 = arith.extui %0 : i1 to i32
    %c0_i32_0 = arith.constant 0 : i32
    %2 = arith.cmpi ne, %1, %c0_i32_0 : i32
    scf.if %2 {
      %cst_12 = arith.constant 0.000000e+00 : f32
      %25 = vector.broadcast %cst_12 : f32 to vector<8x128xf32>
      %c0_13 = arith.constant 0 : index
      %c0_14 = arith.constant 0 : index
      %26 = vector.load %arg4[%c0_13, %c0_14] : memref<8x128xf32, #tpu.memory_space<vmem>>, vector<8x128xf32>
      tpu.vector_store %arg4[%c0_13, %c0_14], %25 {strides = array<i32>} : memref<8x128xf32, #tpu.memory_space<vmem>>, vector<8x128xf32>,
    } else {
    }
    %c1_i32 = arith.constant 1 : i32
    %3 = arith.muli %arg0, %c1_i32 : i32
    %4 = arith.addi %3, %arg1 : i32
    %c16_i32 = arith.constant 16 : i32
    %5 = arith.muli %4, %c16_i32 : i32
    %6 = tpu.iota {dimensions = array<i32: 0>} : vector<16x128xi32>
    %7 = vector.broadcast %5 : i32 to vector<16x128xi32>
    %8 = arith.addi %7, %6 : vector<16x128xi32>
    %c16_i32_1 = arith.constant 16 : i32
    %9 = vector.broadcast %c16_i32_1 : i32 to vector<16x128xi32>
    %10 = arith.cmpi slt, %8, %9 : vector<16x128xi32>
    %c0 = arith.constant 0 : index
    %c0_2 = arith.constant 0 : index
    %11 = vector.load %arg2[%c0, %c0_2] : memref<16x128xf32, #tpu.memory_space<vmem>>, vector<16x128xf32>
    %c0_3 = arith.constant 0 : index
    %c0_4 = arith.constant 0 : index
    %12 = vector.load %arg3[%c0_3, %c0_4] : memref<16x128xf32, #tpu.memory_space<vmem>>, vector<16x128xf32>
    %13 = arith.subf %11, %12 : vector<16x128xf32>
    %cst = arith.constant 0.000000e+00 : f32
    %14 = vector.broadcast %cst : f32 to vector<16x128xf32>
    %15 = arith.select %10, %13, %14 : vector<16x128xi1>, vector<16x128xf32>
    %16 = arith.mulf %15, %15 : vector<16x128xf32>
    %c0_5 = arith.constant 0 : index
    %c0_6 = arith.constant 0 : index
    %17 = vector.load %arg4[%c0_5, %c0_6] : memref<8x128xf32, #tpu.memory_space<vmem>>, vector<8x128xf32>
    %18 = vector.shape_cast %16 : vector<16x128xf32> to vector<2x8x128xf32>
    %cst_7 = arith.constant dense<0.000000e+00> : vector<8x128xf32>
    %19 = vector.multi_reduction <add>, %18, %cst_7 [0] : vector<2x8x128xf32> to vector<8x128xf32>
    %20 = arith.addf %17, %19 : vector<8x128xf32>
    %c0_8 = arith.constant 0 : index
    %c0_9 = arith.constant 0 : index
    %21 = vector.load %arg4[%c0_8, %c0_9] : memref<8x128xf32, #tpu.memory_space<vmem>>, vector<8x128xf32>
    tpu.vector_store %arg4[%c0_8, %c0_9], %20 {strides = array<i32>} : memref<8x128xf32, #tpu.memory_space<vmem>>, vector<8x128xf32>,
    %c0_i32_10 = arith.constant 0 : i32
    %22 = arith.cmpi eq, %arg1, %c0_i32_10 : i32
    %23 = arith.extui %22 : i1 to i32
    %c0_i32_11 = arith.constant 0 : i32
    %24 = arith.cmpi ne, %23, %c0_i32_11 : i32
    scf.if %24 {
      %c0_12 = arith.constant 0 : index
      %c0_13 = arith.constant 0 : index
      %25 = vector.load %arg4[%c0_12, %c0_13] : memref<8x128xf32, #tpu.memory_space<vmem>>, vector<8x128xf32>
      %cst_14 = arith.constant 9.765625E-4 : f32
      %26 = vector.broadcast %cst_14 : f32 to vector<8x128xf32>
      %27 = arith.mulf %25, %26 : vector<8x128xf32>
      %c0_15 = arith.constant 0 : index
      %c0_16 = arith.constant 0 : index
      %28 = vector.load %arg4[%c0_15, %c0_16] : memref<8x128xf32, #tpu.memory_space<vmem>>, vector<8x128xf32>
      tpu.vector_store %arg4[%c0_15, %c0_16], %27 {strides = array<i32>} : memref<8x128xf32, #tpu.memory_space<vmem>>, vector<8x128xf32>,
    } else {
    }
    return
  }
  func.func @transform_0(%arg0: i32, %arg1: i32) -> (i32, i32) {
    %c1_i32 = arith.constant 1 : i32
    %0 = arith.muli %arg0, %c1_i32 : i32
    %1 = arith.addi %0, %arg1 : i32
    %c0_i32 = arith.constant 0 : i32
    %2 = arith.minsi %1, %c0_i32 : i32
    %c0_i32_0 = arith.constant 0 : i32
    %c0_i32_1 = arith.constant 0 : i32
    return %2, %c0_i32_0 : i32, i32
  }
  func.func @transform_1(%arg0: i32, %arg1: i32) -> (i32, i32) {
    %c1_i32 = arith.constant 1 : i32
    %0 = arith.muli %arg0, %c1_i32 : i32
    %1 = arith.addi %0, %arg1 : i32
    %c0_i32 = arith.constant 0 : i32
    %2 = arith.minsi %1, %c0_i32 : i32
    %c0_i32_0 = arith.constant 0 : i32
    %c0_i32_1 = arith.constant 0 : i32
    return %2, %c0_i32_0 : i32, i32
  }
  func.func @transform_2(%arg0: i32, %arg1: i32) -> (i32, i32) {
    %c0_i32 = arith.constant 0 : i32
    %c0_i32_0 = arith.constant 0 : i32
    return %arg0, %c0_i32 : i32, i32
  }
}

</mosaic_0001>

<bundles_post_ra>
// kernel: tpu_custom_call.1
= control target key start
LH: loop header
LB: loop body
LE: loop exit
PB: predicated region body
PF: predicated region fallthrough
CT: control target
= control target key end

     0   :  { %7 = vsyncpa [#allocation3], 0  ;;  %s898_s0 = inlined_call_operand.hbm [shape: f32[16,128], index: 0, kind: input, shape index: {}]   ;;  %s899_s1 = inlined_call_operand.hbm [shape: f32[16,128], index: 1, kind: input, shape index: {}]   ;;  %s900_s2 = inlined_call_operand.hbm [shape: f32[16,128], index: 2, kind: output, shape index: {}]  }
   0x1   :  { %9 = vsyncpa [#allocation3 + $0x1], 0 }
   0x2   :  { %10 = vsyncpa [#allocation6], 0 }
   0x3   :  { %12 = vsyncpa [#allocation6 + $0x1], 0 }
   0x4   :  { %13 = vsyncpa [#allocation4], 0 }
   0x5   :  { %15 = vsyncpa [#allocation4 + $0x1], 0  ;;  %s694_s9 = smov 0   ;;  %s696_s10 = smov 0  }
   0x6   :  { %s698_s11 = smov 0   ;;  %s700_s12 = smov 0  }
   0x7   :  { %s702_s13 = smov 0   ;;  %s704_s14 = smov 0  }
   0x8   :  { %s706_s15 = smov 0   ;;  %s708_s16 = smov 0  }
   0x9 LB: > { %s390_s17 = sadd.s32 4294967295, %s672_s16   ;;  %s391_s18 = sadd.s32 4294967294, %s672_s16   ;;  %s672_s16 = sphi %s708_s16, %s21_s16   ;;  %s668_s15 = sphi %s706_s15, %s919_s15   ;;  %s664_s14 = sphi %s704_s14, %s918_s14   ;;  %s660_s13 = sphi %s702_s13, %s888_s13   ;;  %s656_s12 = sphi %s700_s12, %s917_s12   ;;  %s652_s11 = sphi %s698_s11, %s916_s11   ;;  %s648_s10 = sphi %s696_s10, %s915_s10   ;;  %s644_s9 = sphi %s694_s9, %s914_s9  }
   0xa   : > { %s33_s19 = sadd.s32 1, %s668_s15  ;;  %p641_p1 = scmp.ne.s32.totalorder %s660_s13, 0 }
   0xb   : > { %p35_p0 = scmp.ge.s32.totalorder %s33_s19, 2  ;;  %p54_p2 = scmp.eq.s32.totalorder %s672_s16, 0 }
   0xc   : > { %p59_p3 = scmp.ne.s32.totalorder %s660_s13, %s656_s12  ;;  %p60_p5 = scmp.eq.s32.totalorder %s390_s17, 0 }
   0xd   : > { %s921_s19 = smov (%p35_p0, %s33_s19), 0  ;;  %p740_p4 = por %p641_p1, %p54_p2 }
   0xe   : > { %p744_p6 = por %p60_p5, %p59_p3  ;;  %s101_s22 = ssub.s32 %s668_s15, %s921_s19 }
   0xf   : > { %p102_p7 = scmp.eq.s32.totalorder %s101_s22, 0  ;;  %s104_s23 = sadd.s32 1, %s652_s11 }
  0x10   : > { %s904_s21 = scalar_select %p744_p6, 1, 0 }
  0x11   : > { %s752_s24 = scalar_select %p102_p7, %s652_s11, %s104_s23  }
  0x12   : > { %p114_p8 = scmp.ne.s32.totalorder %s652_s11, %s648_s10  ;;  %p115_p9 = scmp.eq.s32.totalorder %s390_s17, 1 }
  0x13   : > { %p120_p10 = scmp.ne.s32.totalorder %s648_s10, %s644_s9  ;;  %p121_p11 = scmp.eq.s32.totalorder %s391_s18, 1 }
  0x14   : > { %p758_p12 = por %p115_p9, %p114_p8  ;;  %p428_p1 = scmp.lt.s32.totalorder %s672_s16, 2 }
  0x15   : > { %p763_p0 = por %p121_p11, %p120_p10  ;;  %s674_s27 = smov [#allocation2]  }
  0x16   : > { %s905_s25 = scalar_select %p758_p12, 1, 0 }
  0x17   : > { %s906_s26 = scalar_select %p763_p0, 1, 0 }
  0x18   : > { %s155_s28 = sshll.u32 %s674_s27, 4  ;;  %p770_p2 = pnand %p428_p1, %p740_p4  ;;  %s156_s28 = int_to_ptr.vmem [resolvable:$true] %s155_s28 }
  0x19   : > { %s505_s4 = scalar_lea.hbm %s898_s0, 256 }
  0x1a   : > { %p506_p3 = scmp.ne.s32.totalorder %s898_s0, %s505_s4  ;;  %p507_p5 = pneg %p770_p2 }
  0x1b   : > { %p512_p8 = scmp.lt.u32.totalorder %s505_s4, %s505_s4  ;;  %p514_p9 = scmp.lt.u32.totalorder %s505_s4, %s898_s0 }
  0x1c   : > { %p508_p7 = pnand %p507_p5, %p506_p3 }
  0x1d   : > { %p515_p10 = por %p514_p9, %p512_p8 }
  0x1e   : > { %p509_p4 = pneg %p508_p7 }
  0x20   : > { %p516_p11 = pnand %p515_p10, %p509_p4 }
  0x22   : > { %519 = shalt.err (!%p516_p11)
}
  0x23   : > { %s520_s12 = scalar_lea.vmem %s156_s28, 256  ;;  %s527_s17 = scalar_lea.vmem %s156_s28, 512 }
  0x24   : > { %p521_p1 = scmp.ne.s32.totalorder %s156_s28, %s520_s12  ;;  %p528_p12 = scmp.lt.s32.totalorder %s156_s28, %s156_s28 }
  0x25   : > { %p529_p6 = scmp.lt.s32.totalorder %s527_s17, %s520_s12 }
  0x26   : > { %p523_p13 = pnand %p521_p1, %p507_p5 }
  0x27   : > { %p530_p3 = por %p529_p6, %p528_p12 }
  0x28   : > { %p524_p0 = pneg %p523_p13 }
  0x2a   : > { %p531_p7 = pnand %p530_p3, %p524_p0 }
  0x2c   : > { %534 = shalt.err (!%p531_p7)
}
  0x2d   : > { %s675_s18 = smov 128   ;;  %s676_s20 = smov 8  }
  0x2e   : > { %420 = dma.hbm_to_vmem [thread:$0]  (!%p770_p2), %s898_s0, 256, %s156_s28, [#allocation3], %s675_s18, %s675_s18, %s676_s20  }
  0x2f   : > { %p400_p13 = scmp.ge.s32.totalorder %s672_s16, 1  ;;  %p187_p4 = scmp.lt.s32.totalorder %s672_s16, 3 }
  0x30   : > { %s677_s30 = smov [#allocation5]   ;;  %s535_s6 = scalar_lea.hbm %s899_s1, 256 }
  0x31   : > { %p801_p8 = pnand %p400_p13, %p187_p4  ;;  %s179_s3 = sshll.u32 %s677_s30, 4  ;;  %s180_s3 = int_to_ptr.vmem [resolvable:$true] %s179_s3 }
  0x32   : > { %p536_p6 = scmp.ne.s32.totalorder %s899_s1, %s535_s6  ;;  %p542_p9 = scmp.lt.u32.totalorder %s535_s6, %s535_s6 }
  0x33   : > { %s908_s27 = scalar_select %p801_p8, 1, 0 }
  0x34   : > { %p538_p12 = pnand %p536_p6, %p507_p5  ;;  %p544_p10 = scmp.lt.u32.totalorder %s535_s6, %s899_s1 }
  0x36   : > { %p539_p0 = pneg %p538_p12  ;;  %p545_p11 = por %p544_p10, %p542_p9 }
  0x38   : > { %p546_p1 = pnand %p545_p11, %p539_p0 }
  0x3a   : > { %549 = shalt.err (!%p546_p1)
}
  0x3b   : > { %s550_s17 = scalar_lea.vmem %s180_s3, 256  ;;  %s557_s22 = scalar_lea.vmem %s180_s3, 512 }
  0x3c   : > { %p551_p3 = scmp.ne.s32.totalorder %s180_s3, %s550_s17  ;;  %p558_p4 = scmp.lt.s32.totalorder %s180_s3, %s180_s3 }
  0x3d   : > { %p559_p8 = scmp.lt.s32.totalorder %s557_s22, %s550_s17 }
  0x3e   : > { %p553_p7 = pnand %p551_p3, %p507_p5 }
  0x3f   : > { %p560_p6 = por %p559_p8, %p558_p4 }
  0x40   : > { %p554_p13 = pneg %p553_p7 }
  0x42   : > { %p561_p12 = pnand %p560_p6, %p554_p13 }
  0x44   : > { %564 = shalt.err (!%p561_p12)
}
  0x45   : > { %423 = dma.hbm_to_vmem [thread:$0]  (!%p770_p2), %s899_s1, 256, %s180_s3, [#allocation6], %s675_s18, %s675_s18, %s676_s20  }
  0x46   : > { %p909_p0 = scmp.ne.s32.totalorder %s908_s27, 0 }
  0x47   : > { %s193_s4 = sand.u32 (!%p909_p0), 1, %s660_s13   ;;  %p910_p5 = scmp.ne.s32.totalorder (!%p909_p0), %s904_s21, 0 }
  0x48   : > { %191 = sbr.rel (%p909_p0) target bundleno = 112 (0x70), region = 28  ;;  %s401_s5 = sshll.u32 (!%p909_p0), %s193_s4, 4 }
  0x49   : > { %s194_s6 = scalar_lea.sflag (!%p909_p0), [#allocation3], %s193_s4  ;;  %s197_s7 = scalar_lea.vmem (!%p909_p0), [#allocation2], %s401_s5 }
  0x4f   : > { %630 = dma.done.wait (%p910_p5), %s194_s6, 256  }
  0x50   : > { %632 = vsyncadd (%p910_p5), %s194_s6, 4294967040  ;;  %s203_s29 = scalar_lea.sflag [#allocation6], %s193_s4  ;;  %s206_s8 = scalar_lea.vmem [#allocation5], %s401_s5 }
  0x51   : > { %634 = dma.done.wait (%p910_p5), %s203_s29, 256  }
  0x52   : > { %636 = vsyncadd (%p910_p5), %s203_s29, 4294967040  ;;  %s404_s18 = sshll.u32 %s664_s14, 4  ;;  %v247_v0 = vlaneseq  ;;  %s229_s20 = sand.u32 1, %s648_s10   ;;  %v255_v6 = vld [vmem:[%s197_s7] sm:$0xff]  ;;  %v256_v7 = vld [vmem:[%s197_s7 + $0x8] sm:$0xff] }
  0x53   : > { %v250_v1 = vstv %s404_s18  ;;  %v257_v8 = vld [vmem:[%s206_s8] sm:$0xff]  ;;  %v258_v9 = vld [vmem:[%s206_s8 + $0x8] sm:$0xff]  ;;  %s403_s21 = sshll.u32 %s229_s20, 3  ;;  %s406_s27 = sshll.u32 %s664_s14, 7 }
  0x54   : > { %v248_v2 = vshrl.u32 %v247_v0, 7  ;;  %v259_v10 = vsub.f32 %v255_v6, %v257_v8  ;;  %v260_v11 = vsub.f32 %v256_v7, %v258_v9  ;;  %s231_s3 = scalar_lea.vmem [#allocation7], %s403_s21  ;;  %s845_s22 = scalar_lea.hbm %s900_s2, %s406_s27 }
  0x55   : > { %s289_s28 = sshll.u32 %s231_s3, 4  ;;  %s276_s23 = scalar_lea.sflag [#allocation4], %s229_s20  ;;  %s847_s28 = int_to_ptr.vmem [resolvable:$true] %s289_s28 }
  0x56   : > { %v249_v3 = vadd.s32 8, %v248_v2  ;;  %v251_v4 = vadd.s32 %v250_v1, %v248_v2  ;;  %s565_s30 = scalar_lea.vmem %s847_s28, 128  ;;  %p911_p8 = scmp.ne.s32.totalorder %s905_s25, 0 }
  0x57   : > { %p566_p2 = scmp.ne.s32.totalorder %s847_s28, %s565_s30  ;;  %s678_s14 = smov [#allocation7]  }
  0x58   : > { %v252_v5 = vadd.s32 %v250_v1, %v249_v3  ;;  %vm253_vm0 = vcmp.lt.s32.totalorder %v251_v4, 16  ;;  %s569_s4 = sshll.u32 %s678_s14, 4  ;;  %s570_s4 = int_to_ptr.vmem [resolvable:$false] %s569_s4 }
  0x59   : > { %v261_v12 = vsel %vm253_vm0, %v259_v10, 0.0  ;;  %p567_p9 = pnand %p566_p2, %p911_p8  ;;  %s571_s5 = scalar_lea.vmem %s570_s4, 256 }
  0x5a   : > { %vm254_vm1 = vcmp.lt.s32.totalorder %v252_v5, 16  ;;  %v263_v14 = vmul.f32 %v261_v12, %v261_v12  ;;  %p572_p11 = scmp.lt.s32.totalorder %s847_s28, %s570_s4  ;;  %p573_p1 = scmp.lt.s32.totalorder %s571_s5, %s565_s30 }
  0x5b   : > { %v262_v13 = vsel %vm254_vm1, %v260_v11, 0.0  ;;  %p568_p10 = pneg %p567_p9 }
  0x5c   : > { %v264_v15 = vmul.f32 %v262_v13, %v262_v13  ;;  %p574_p3 = por %p573_p1, %p572_p11 }
  0x5e   : > { %v266_v16 = vadd.f32 %v264_v15, %v263_v14  ;;  %p575_p7 = pnand %p574_p3, %p568_p10 }
  0x60   : > { %v273_v17 = vmul.f32 0.0009765625, %v266_v16 }
  0x62   : > { %274 = vst [vmem:[%s231_s3] sm:$0xff] %v273_v17 }
  0x63   : > { %578 = shalt.err (!%p575_p7)
}
  0x64   : > { %s579_s6 = scalar_lea.hbm %s845_s22, 128  ;;  %s583_s8 = scalar_lea.hbm %s900_s2, 256 }
  0x65   : > { %p580_p13 = scmp.ne.s32.totalorder %s845_s22, %s579_s6  ;;  %p584_p12 = scmp.lt.u32.totalorder %s845_s22, %s900_s2 }
  0x66   : > { %p585_p0 = scmp.lt.u32.totalorder %s583_s8, %s579_s6  ;;  %p587_p2 = scmp.lt.u32.totalorder %s579_s6, %s845_s22 }
  0x67   : > { %p581_p4 = pnand %p580_p13, %p911_p8 }
  0x68   : > { %p586_p5 = por %p585_p0, %p584_p12 }
  0x69   : > { %p582_p6 = pneg %p581_p4 }
  0x6a   : > { %p588_p9 = por %p587_p2, %p586_p5 }
  0x6c   : > { %p589_p10 = pnand %p588_p9, %p582_p6 }
  0x6e   : > { %592 = shalt.err (!%p589_p10)
}
  0x6f   : > { %415 = dma.vmem_to_hbm [thread:$0]  (%p911_p8), %s847_s28, 128, %s845_s22, %s276_s23  }
  0x70 PF: > { %s301_s21 = sand.u32 1, %s644_s9   ;;  %p912_p11 = scmp.ne.s32.totalorder %s906_s26, 0 }
  0x71   : > { %p913_p1 = scmp.ge.s32.totalorder %s672_s16, 2  ;;  %s302_s27 = scalar_lea.sflag [#allocation4], %s301_s21 }
  0x73   : > { %p425_p3 = pnand %p913_p1, %p912_p11 }
  0x75   : > { %638 = dma.done.wait (!%p425_p3), %s302_s27, 128  }
  0x76   : > { %640 = vsyncadd (!%p425_p3), %s302_s27, 4294967168  ;;  %s21_s16 = sadd.s32 1, %s672_s16   ;;  %s914_s9 = smov %s648_s10 }
  0x77   : > { %p18_p7 = scmp.ge.s32.totalorder %s21_s16, 4   ;;  %s915_s10 = smov %s652_s11 }
  0x78   : > { %s916_s11 = smov %s752_s24  ;;  %s917_s12 = smov %s660_s13 }
  0x79   : > { %s888_s13 = smov 0   ;;  %s918_s14 = smov %s668_s15 }
  0x7a   : > { %s919_s15 = smov %s921_s19  ;;  %20 = sbr.rel (!%p18_p7) target bundleno = 9 (0x9), region = 94 }
  0x81   :  { %307 = vsyncpa [#allocation3], 1 }
  0x82   :  { %309 = vsyncpa [#allocation3 + $0x1], 1 }
  0x83   :  { %310 = vsyncpa [#allocation6], 1 }
  0x84   :  { %312 = vsyncpa [#allocation6 + $0x1], 1 }
  0x85   :  { %313 = vsyncpa [#allocation4], 1 }
  0x86   :  { %315 = vsyncpa [#allocation4 + $0x1], 1 }

</bundles_post_ra>
